<compile_context>
chip_gen: v5e
topology: v5e:2x2
jax: 0.10.0
libtpu: 0.0.40
codegen_flags: <defaults>
</compile_context>

<pallas_src>
import jax
import jax.numpy as jnp
from jax.experimental import pallas as pl
from jax.experimental.pallas import tpu as pltpu


def _round_up(x, m):
    return (x + m - 1) // m * m


def mlp_kernel(x_ref,
               w1_ref, t1_ref,
               w2_ref, t2_ref,
               w3_ref, b3_ref,
               o_ref):
    """Fused 3-layer pointwise MLP on one channel-major spatial tile.

    x_ref : [C_in, T]        spatial tile, T on the 128-lane axis
    wK    : [C_k, C_{k-1}]   conv weights with BN scale folded in (layers 1,2)
    tK    : [C_k, 1]         folded additive shift (conv bias + BN shift)
    b3    : [C_out, 1]       last-layer bias (no BN / no ReLU)
    o_ref : [C_out, T]
    """
    x = x_ref[...]

    h = jnp.dot(w1_ref[...], x, preferred_element_type=jnp.float32)
    h = jnp.maximum(h + t1_ref[...], 0.0)

    h = jnp.dot(w2_ref[...], h, preferred_element_type=jnp.float32)
    h = jnp.maximum(h + t2_ref[...], 0.0)

    h = jnp.dot(w3_ref[...], h, preferred_element_type=jnp.float32)
    o_ref[...] = (h + b3_ref[...]).astype(o_ref.dtype)


def _const_spec(shape):
    # Small parameter, resident in VMEM, same block every grid step.
    nd = len(shape)
    return pl.BlockSpec(shape, lambda b, j: (0,) * nd)


def mlp_forward(x_nchw, params, *, tile_hw=2048):
    """Runs the fused MLP.  x_nchw: [B, C_in, H, W] -> [B, C_out, H, W]."""
    B, C_in, H, W = x_nchw.shape
    C_out = params["w3"].shape[0]
    HW = H * W

    # Lane-dense tile: multiple of 128, no bigger than (padded) HW.
    tile_hw = _round_up(tile_hw, 128)
    tile_hw = min(tile_hw, _round_up(HW, 128))
    hw_padded = _round_up(HW, tile_hw)

    # NCHW -> [B, C, HW] is a free reshape (contiguous); pad spatial tail.
    x_flat = x_nchw.reshape(B, C_in, HW)
    if hw_padded != HW:
        x_flat = jnp.pad(x_flat, ((0, 0), (0, 0), (0, hw_padded - HW)))

    grid = (B, hw_padded // tile_hw)

    out = pl.pallas_call(
        mlp_kernel,
        out_shape=jax.ShapeDtypeStruct((B, C_out, hw_padded), x_nchw.dtype),
        grid_spec=pltpu.PrefetchScalarGridSpec(
            num_scalar_prefetch=0,
            grid=grid,
            in_specs=[
                pl.BlockSpec((None, C_in, tile_hw), lambda b, j: (b, 0, j)),
                _const_spec(params["w1"].shape),
                _const_spec(params["t1"].shape),
                _const_spec(params["w2"].shape),
                _const_spec(params["t2"].shape),
                _const_spec(params["w3"].shape),
                _const_spec(params["b3"].shape),
            ],
            out_specs=pl.BlockSpec((None, C_out, tile_hw),
                                   lambda b, j: (b, 0, j)),
        ),
        compiler_params=pltpu.CompilerParams(
            dimension_semantics=("parallel", "parallel")),
    )(x_flat,
      params["w1"], params["t1"],
      params["w2"], params["t2"],
      params["w3"], params["b3"])

    # Drop spatial padding, reshape back to NCHW (free, contiguous).
    return out[:, :, :HW].reshape(B, C_out, H, W)


def make_params(key, in_channel, mlp_channels, eps=1e-5):
    """Deterministic synthetic parameters (conv weights/biases, BN affine).

    Weights are stored PyTorch-native [C_out, C_in].  For the BN+ReLU layers
    the BN scale (gamma * rsqrt(var + eps)) is folded into the weight rows,
    leaving only an additive per-channel shift t = (bias - mean)*s + beta.
    """
    chans = [in_channel] + list(mlp_channels)
    n = len(mlp_channels)
    keys = jax.random.split(key, 4 * n)
    raw = {}
    for li in range(n):
        cin, cout = chans[li], chans[li + 1]
        k_w, k_b, k_g, k_be = keys[4 * li:4 * li + 4]
        raw[f"w{li + 1}"] = (jax.random.normal(k_w, (cout, cin), jnp.float32)
                             * (1.0 / jnp.sqrt(cin)))
        raw[f"b{li + 1}"] = jax.random.normal(k_b, (cout,), jnp.float32) * 0.1
        raw[f"gamma{li + 1}"] = 1.0 + 0.1 * jax.random.normal(k_g, (cout,), jnp.float32)
        raw[f"beta{li + 1}"] = 0.1 * jax.random.normal(k_be, (cout,), jnp.float32)
        # eval-mode running stats (BatchNorm defaults)
        raw[f"mean{li + 1}"] = jnp.zeros((cout,), jnp.float32)
        raw[f"var{li + 1}"] = jnp.ones((cout,), jnp.float32)

    params = {}
    for li in range(1, n):  # layers with BN+ReLU
        s = raw[f"gamma{li}"] * jax.lax.rsqrt(raw[f"var{li}"] + eps)
        params[f"w{li}"] = raw[f"w{li}"] * s[:, None]          # scale folded in
        params[f"t{li}"] = ((raw[f"b{li}"] - raw[f"mean{li}"]) * s
                            + raw[f"beta{li}"])[:, None]       # [C, 1]
    # Last layer: plain conv (skip_last=True -> no BN, no ReLU, no last_acti)
    params[f"w{n}"] = raw[f"w{n}"]
    params[f"b{n}"] = raw[f"b{n}"][:, None]
    return params


def reference_forward(x_nchw, params):
    """Pure-JAX reference of the same fused math (for a sanity check)."""
    B, C, H, W = x_nchw.shape
    x = x_nchw.reshape(B, C, H * W)
    h = jnp.maximum(jnp.einsum("oc,bct->bot", params["w1"], x) + params["t1"], 0.0)
    h = jnp.maximum(jnp.einsum("oc,bct->bot", params["w2"], h) + params["t2"], 0.0)
    h = jnp.einsum("oc,bct->bot", params["w3"], h) + params["b3"]
    return h.reshape(B, -1, H, W)


if __name__ == "__main__":
    key = jax.random.PRNGKey(0)
    k_x, k_p = jax.random.split(key)

    B, C_in, H, W = 2, 4, 16, 16
    mlp_channels = (32, 32, 16)

    x = jax.random.normal(k_x, (B, C_in, H, W), jnp.float32)
    params = make_params(k_p, C_in, mlp_channels)

    out = jax.block_until_ready(mlp_forward(x, params))

    ref = reference_forward(x, params)
    assert out.shape == (B, mlp_channels[-1], H, W)
    assert jnp.allclose(out, ref, atol=1e-4, rtol=1e-4)

    print("KERNEL_OK")
</pallas_src>

<mosaic_0001>
module attributes {stable_mosaic.version = 11 : i64} {
  func.func @mlp_kernel(%arg0: i32, %arg1: i32, %arg2: memref<1x4x256xf32, #tpu.memory_space<vmem>>, %arg3: memref<32x4xf32, #tpu.memory_space<vmem>>, %arg4: memref<32x1xf32, #tpu.memory_space<vmem>>, %arg5: memref<32x32xf32, #tpu.memory_space<vmem>>, %arg6: memref<32x1xf32, #tpu.memory_space<vmem>>, %arg7: memref<16x32xf32, #tpu.memory_space<vmem>>, %arg8: memref<16x1xf32, #tpu.memory_space<vmem>>, %arg9: memref<1x16x256xf32, #tpu.memory_space<vmem>>) attributes {dimension_semantics = [#tpu.dimension_semantics<parallel>, #tpu.dimension_semantics<parallel>], iteration_bounds = array<i64: 2, 1>, scalar_prefetch = 0 : i64, scratch_operands = 0 : i64, tpu.core_type = #tpu.core_type<tc>, window_params = [{transform_indices = @transform_0, window_bounds = array<i64: 1, 4, 256>}, {pipeline_mode = #tpu.pipeline_mode<synchronous>, transform_indices = @transform_1, window_bounds = array<i64: 32, 4>}, {pipeline_mode = #tpu.pipeline_mode<synchronous>, transform_indices = @transform_2, window_bounds = array<i64: 32, 1>}, {pipeline_mode = #tpu.pipeline_mode<synchronous>, transform_indices = @transform_3, window_bounds = array<i64: 32, 32>}, {pipeline_mode = #tpu.pipeline_mode<synchronous>, transform_indices = @transform_4, window_bounds = array<i64: 32, 1>}, {pipeline_mode = #tpu.pipeline_mode<synchronous>, transform_indices = @transform_5, window_bounds = array<i64: 16, 32>}, {pipeline_mode = #tpu.pipeline_mode<synchronous>, transform_indices = @transform_6, window_bounds = array<i64: 16, 1>}, {transform_indices = @transform_7, window_bounds = array<i64: 1, 16, 256>}]} {
    %c0 = arith.constant 0 : index
    %c0_0 = arith.constant 0 : index
    %c0_1 = arith.constant 0 : index
    %0 = vector.load %arg2[%c0, %c0_0, %c0_1] : memref<1x4x256xf32, #tpu.memory_space<vmem>>, vector<1x4x256xf32>
    %1 = vector.shape_cast %0 : vector<1x4x256xf32> to vector<4x256xf32>
    %c0_2 = arith.constant 0 : index
    %c0_3 = arith.constant 0 : index
    %2 = vector.load %arg3[%c0_2, %c0_3] : memref<32x4xf32, #tpu.memory_space<vmem>>, vector<32x4xf32>
    %cst = arith.constant dense<0.000000e+00> : vector<32x256xf32>
    %3 = tpu.matmul %2, %1, %cst {dimension_numbers = #tpu.dot_dimension_numbers<[1], [0], [0], [1], [0, 0, 1, 1], [], []>} : vector<32x4xf32>, vector<4x256xf32>, vector<32x256xf32> -> vector<32x256xf32>
    %c0_4 = arith.constant 0 : index
    %c0_5 = arith.constant 0 : index
    %4 = vector.load %arg4[%c0_4, %c0_5] : memref<32x1xf32, #tpu.memory_space<vmem>>, vector<32x1xf32>
    %5 = vector.broadcast %4 : vector<32x1xf32> to vector<32x256xf32>
    %6 = arith.addf %3, %5 : vector<32x256xf32>
    %cst_6 = arith.constant 0.000000e+00 : f32
    %7 = vector.broadcast %cst_6 : f32 to vector<32x256xf32>
    %8 = arith.maximumf %6, %7 : vector<32x256xf32>
    %c0_7 = arith.constant 0 : index
    %c0_8 = arith.constant 0 : index
    %9 = vector.load %arg5[%c0_7, %c0_8] : memref<32x32xf32, #tpu.memory_space<vmem>>, vector<32x32xf32>
    %cst_9 = arith.constant dense<0.000000e+00> : vector<32x256xf32>
    %10 = tpu.matmul %9, %8, %cst_9 {dimension_numbers = #tpu.dot_dimension_numbers<[1], [0], [0], [1], [0, 0, 1, 1], [], []>} : vector<32x32xf32>, vector<32x256xf32>, vector<32x256xf32> -> vector<32x256xf32>
    %c0_10 = arith.constant 0 : index
    %c0_11 = arith.constant 0 : index
    %11 = vector.load %arg6[%c0_10, %c0_11] : memref<32x1xf32, #tpu.memory_space<vmem>>, vector<32x1xf32>
    %12 = vector.broadcast %11 : vector<32x1xf32> to vector<32x256xf32>
    %13 = arith.addf %10, %12 : vector<32x256xf32>
    %cst_12 = arith.constant 0.000000e+00 : f32
    %14 = vector.broadcast %cst_12 : f32 to vector<32x256xf32>
    %15 = arith.maximumf %13, %14 : vector<32x256xf32>
    %c0_13 = arith.constant 0 : index
    %c0_14 = arith.constant 0 : index
    %16 = vector.load %arg7[%c0_13, %c0_14] : memref<16x32xf32, #tpu.memory_space<vmem>>, vector<16x32xf32>
    %cst_15 = arith.constant dense<0.000000e+00> : vector<16x256xf32>
    %17 = tpu.matmul %16, %15, %cst_15 {dimension_numbers = #tpu.dot_dimension_numbers<[1], [0], [0], [1], [0, 0, 1, 1], [], []>} : vector<16x32xf32>, vector<32x256xf32>, vector<16x256xf32> -> vector<16x256xf32>
    %c0_16 = arith.constant 0 : index
    %c0_17 = arith.constant 0 : index
    %18 = vector.load %arg8[%c0_16, %c0_17] : memref<16x1xf32, #tpu.memory_space<vmem>>, vector<16x1xf32>
    %19 = vector.broadcast %18 : vector<16x1xf32> to vector<16x256xf32>
    %20 = arith.addf %17, %19 : vector<16x256xf32>
    %c0_18 = arith.constant 0 : index
    %c0_19 = arith.constant 0 : index
    %c0_20 = arith.constant 0 : index
    %21 = vector.load %arg9[%c0_18, %c0_19, %c0_20] : memref<1x16x256xf32, #tpu.memory_space<vmem>>, vector<1x16x256xf32>
    %22 = vector.shape_cast %21 : vector<1x16x256xf32> to vector<16x256xf32>
    %23 = vector.shape_cast %20 : vector<16x256xf32> to vector<1x16x256xf32>
    tpu.vector_store %arg9[%c0_18, %c0_19, %c0_20], %23 {strides = array<i32>} : memref<1x16x256xf32, #tpu.memory_space<vmem>>, vector<1x16x256xf32>,
    return
  }
  func.func @transform_0(%arg0: i32, %arg1: i32) -> (i32, i32, i32) {
    %c0_i32 = arith.constant 0 : i32
    %c0_i32_0 = arith.constant 0 : i32
    return %arg0, %c0_i32, %arg1 : i32, i32, i32
  }
  func.func @transform_1(%arg0: i32, %arg1: i32) -> (i32, i32) {
    %c0_i32 = arith.constant 0 : i32
    %c0_i32_0 = arith.constant 0 : i32
    %c0_i32_1 = arith.constant 0 : i32
    return %c0_i32, %c0_i32_0 : i32, i32
  }
  func.func @transform_2(%arg0: i32, %arg1: i32) -> (i32, i32) {
    %c0_i32 = arith.constant 0 : i32
    %c0_i32_0 = arith.constant 0 : i32
    %c0_i32_1 = arith.constant 0 : i32
    return %c0_i32, %c0_i32_0 : i32, i32
  }
  func.func @transform_3(%arg0: i32, %arg1: i32) -> (i32, i32) {
    %c0_i32 = arith.constant 0 : i32
    %c0_i32_0 = arith.constant 0 : i32
    %c0_i32_1 = arith.constant 0 : i32
    return %c0_i32, %c0_i32_0 : i32, i32
  }
  func.func @transform_4(%arg0: i32, %arg1: i32) -> (i32, i32) {
    %c0_i32 = arith.constant 0 : i32
    %c0_i32_0 = arith.constant 0 : i32
    %c0_i32_1 = arith.constant 0 : i32
    return %c0_i32, %c0_i32_0 : i32, i32
  }
  func.func @transform_5(%arg0: i32, %arg1: i32) -> (i32, i32) {
    %c0_i32 = arith.constant 0 : i32
    %c0_i32_0 = arith.constant 0 : i32
    %c0_i32_1 = arith.constant 0 : i32
    return %c0_i32, %c0_i32_0 : i32, i32
  }
  func.func @transform_6(%arg0: i32, %arg1: i32) -> (i32, i32) {
    %c0_i32 = arith.constant 0 : i32
    %c0_i32_0 = arith.constant 0 : i32
    %c0_i32_1 = arith.constant 0 : i32
    return %c0_i32, %c0_i32_0 : i32, i32
  }
  func.func @transform_7(%arg0: i32, %arg1: i32) -> (i32, i32, i32) {
    %c0_i32 = arith.constant 0 : i32
    %c0_i32_0 = arith.constant 0 : i32
    return %arg0, %c0_i32, %arg1 : i32, i32, i32
  }
}

</mosaic_0001>

<bundles_post_ra>
// kernel: tpu_custom_call.1
= control target key start
LH: loop header
LB: loop body
LE: loop exit
PB: predicated region body
PF: predicated region fallthrough
CT: control target
= control target key end

     0   :  { %12 = vsyncpa [#allocation3], 0  ;;  %s1105_s0 = inlined_call_operand.vmem [shape: f32[2,4,256], index: 0, kind: input, shape index: {}]   ;;  %s1106_s1 = inlined_call_operand.vmem [shape: f32[32,4], index: 1, kind: input, shape index: {}]   ;;  %s1107_s2 = inlined_call_operand.vmem [shape: f32[32,1], index: 2, kind: input, shape index: {}]   ;;  %s1108_s3 = inlined_call_operand.vmem [shape: f32[32,32], index: 3, kind: input, shape index: {}]   ;;  %s1109_s4 = inlined_call_operand.vmem [shape: f32[32,1], index: 4, kind: input, shape index: {}]   ;;  %s1110_s5 = inlined_call_operand.vmem [shape: f32[16,32], index: 5, kind: input, shape index: {}]   ;;  %s1111_s6 = inlined_call_operand.vmem [shape: f32[16,1], index: 6, kind: input, shape index: {}]   ;;  %s1112_s7 = inlined_call_operand.hbm [shape: f32[2,16,256], index: 7, kind: output, shape index: {}]  }
   0x1   :  { %14 = vsyncpa [#allocation3 + $0x1], 0  ;;  %s928_s24 = smov 0   ;;  %s930_s25 = smov 0  }
   0x2   :  { %s932_s26 = smov 0   ;;  %s934_s27 = smov 0  }
   0x3   :  { %s936_s28 = smov 0   ;;  %s938_s29 = smov 0  }
   0x4 LB: > { %s699_s30 = sadd.s32 4294967295, %s883_s29   ;;  %s700_s8 = sadd.s32 4294967294, %s883_s29   ;;  %s883_s29 = sphi %s938_s29, %s20_s29   ;;  %s879_s28 = sphi %s936_s28, %s1119_s28   ;;  %s875_s27 = sphi %s934_s27, %s1118_s27   ;;  %s871_s26 = sphi %s932_s26, %s1117_s26   ;;  %s867_s25 = sphi %s930_s25, %s1116_s25   ;;  %s863_s24 = sphi %s928_s24, %s1115_s24  }
   0x5   : > { %s32_s9 = sadd.s32 1, %s879_s28  ;;  %s195_s10 = sadd.s32 1, %s871_s26 }
   0x6   : > { %p34_p0 = scmp.ge.s32.totalorder %s32_s9, 2  ;;  %p205_p1 = scmp.ne.s32.totalorder %s871_s26, %s867_s25 }
   0x7   : > { %p206_p2 = scmp.eq.s32.totalorder %s699_s30, 1  ;;  %p211_p3 = scmp.ne.s32.totalorder %s867_s25, %s863_s24 }
   0x8   : > { %s1121_s9 = smov (%p34_p0, %s32_s9), 0  ;;  %p212_p5 = scmp.eq.s32.totalorder %s700_s8, 1 }
   0x9   : > { %p968_p4 = por %p206_p2, %p205_p1  ;;  %s190_s12 = ssub.s32 %s879_s28, %s1121_s9 }
   0xa   : > { %p703_p6 = scmp.ge.s32.totalorder %s883_s29, 1  ;;  %p193_p7 = scmp.eq.s32.totalorder %s190_s12, 0 }
   0xb   : > { %p975_p8 = por %p212_p5, %p211_p3  ;;  %p261_p9 = scmp.lt.s32.totalorder %s883_s29, 3 }
   0xc   : > { %s981_s14 = scalar_select %p193_p7, %s871_s26, %s195_s10  }
   0xd   : > { %p262_p10 = pnand %p703_p6, %p261_p9 }
   0xe   : > { %p298_p11 = scmp.lt.s32.totalorder (!%p262_p10), %s875_s27, 1  ;;  %s294_s21 = sand.u32 (!%p262_p10), 1, %s867_s25  }
   0xf   : > { %265 = sbr.rel (%p262_p10) target bundleno = 502 (0x1f6), region = 48  ;;  %s704_s22 = sshll.u32 (!%p262_p10), %s294_s21, 5 }
  0x10   : > { %s296_s12 = scalar_lea.vmem (!%p262_p10), [#allocation2], %s704_s22  ;;  %s825_s22 = scalar_lea.hbm (!%p262_p10), %s1112_s7, 64 }
  0x11   : > { %s617_s15 = sshll.u32 (!%p262_p10), %s296_s12, 4  ;;  %s618_s15 = int_to_ptr.vmem [resolvable:$true] %s617_s15 }
  0x14   : > { %v314_v0 = vld [vmem:[%s1107_s2 + $0x8] sm:$0xff]  ;;  %v885_v1 = vmov 0   ;;  %v316_v2 = vld [vmem:[%s1107_s2 + $0x18] sm:$0xff]  ;;  %s299_s19 = scalar_select %p298_p11, %s875_s27, 1  ;;  %v313_v4 = vld [vmem:[%s1107_s2] sm:$0xff]  ;;  %vm354_vm0 = vcmask 1043456  }
  0x15   : > { %803 = vset.pattern.permute.xlu1 %v885_v1  ;;  %802 = vset.pattern.permute.xlu0 %v885_v1  ;;  %v315_v5 = vld [vmem:[%s1107_s2 + $0x10] sm:$0xff]  ;;  %v309_v6 = vld [vmem:[%s1106_s1] sm:$0xff]  ;;  %vm341_vm1 = vcmask 31744   ;;  %v430_v9 = vld [vmem:[%s1109_s4 + $0x8] sm:$0xff]  ;;  %vm453_vm2 = vcmask 261120  }
  0x16   : > { %324 = vperm.xlu1 %803, %v314_v0   ;;  %334 = vperm.xlu0 %802, %v316_v2   ;;  %s734_s20 = sshll.u32 %s299_s19, 3  ;;  %v429_v10 = vld [vmem:[%s1109_s4] sm:$0xff]  ;;  %v310_v11 = vld [vmem:[%s1106_s1 + $0x8] sm:$0xff]  ;;  %v311_v13 = vld [vmem:[%s1106_s1 + $0x10] sm:$0xff] }
  0x17   : > { %804 = vset.pattern.permute.xlu2 %v885_v1  ;;  %s305_s23 = scalar_lea.vmem %s1105_s0, %s734_s20  ;;  %v535_v12 = vld [vmem:[%s1111_s6 + $0x8] sm:$0xff]  ;;  %v312_v14 = vld [vmem:[%s1106_s1 + $0x18] sm:$0xff]  ;;  %v425_v44 = vld [vmem:[%s1108_s3] sm:$0xff] }
  0x18   : > { %v308_v3 = vld [vmem:[%s305_s23] sm:$0xff]  ;;  %v432_v35 = vld [vmem:[%s1109_s4 + $0x18] sm:$0xff]  ;;  %v431_v45 = vld [vmem:[%s1109_s4 + $0x10] sm:$0xff]  ;;  %s735_s23 = sshll.u32 %s875_s27, 5  ;;  %s603_s27 = scalar_lea.sflag [#allocation3], %s294_s21 }
  0x19   : > { %338 = vst [vmem:[#allocation1] ss:$2 sm:$0xff] %v308_v3  ;;  %450 = vperm.xlu2 %804, %v432_v35   ;;  %v426_v46 = vld [vmem:[%s1108_s3 + $0x8] sm:$0xff]  ;;  %v534_v47 = vld [vmem:[%s1111_s6] sm:$0xff]  ;;  %v427_v48 = vld [vmem:[%s1108_s3 + $0x10] sm:$0xff]  ;;  %s616_s10 = scalar_lea.hbm %s1112_s7, %s735_s23 }
  0x1a   : > { %v428_v49 = vld [vmem:[%s1108_s3 + $0x18] sm:$0xff]  ;;  %s619_s16 = sshll.u32 %s616_s10, 4  ;;  %s620_s16 = int_to_ptr.hbm [resolvable:$true] %s619_s16 }
  0x1b   : > { %s819_s17 = sshra.s32 %s620_s16, 4  ;;  %s820_s17 = int_to_ptr.hbm [resolvable:$true] %s819_s17 }
  0x1c   : > { %s821_s18 = scalar_lea.hbm %s820_s17, 32  ;;  %p826_p1 = scmp.lt.s32.totalorder %s820_s17, %s1112_s7 }
  0x1d   : > { %p822_p12 = scmp.ne.s32.totalorder %s820_s17, %s821_s18  ;;  %p827_p2 = scmp.lt.s32.totalorder %s825_s22, %s821_s18 }
  0x1e   : > { %319 = vperm.xlu1 %803, %v313_v4   ;;  %329 = vperm.xlu0 %802, %v315_v5  }
  0x1f   : > { %p823_p13 = pnand %p822_p12, %p968_p4  ;;  %p828_p3 = por %p827_p2, %p826_p1 }
  0x20   : > { %v339_v7 = vld.sshfl [vmem:[#allocation1] sm:$0xff pattern:$0x75316420]  ;;  %v340_v8 = vld.sshfl [vmem:[#allocation1 + $0x8] sm:$0xff pattern:$0x75316420] }
  0x21   : > { %707 = vmatpush.msk.msra.mxu0 %vm354_vm0, %v339_v7  ;;  %712 = vmatpush.msk.msra.mxu1 %vm354_vm0, %v340_v8  ;;  %p824_p0 = pneg %p823_p13 }
  0x22   : > { %708 = vmatmul.msk.f32.vlgmr.msra.gmra.mxu0 %vm341_vm1, %v309_v6  ;;  %713 = vmatmul.msk.f32.vlgmr.msra.gmra.mxu1 %vm341_vm1, %v309_v6 }
  0x23   : > { %445 = vperm.xlu2 %804, %v431_v45   ;;  %p829_p5 = pnand %p828_p3, %p824_p0 }
  0x26   : > { %440 = vperm.xlu0 %802, %v430_v9   ;;  %435 = vperm.xlu1 %803, %v429_v10  }
  0x2a   : > { %709 = vmatmul.msk.f32.gmra.mxu0 %vm341_vm1, %v310_v11  ;;  %714 = vmatmul.msk.f32.gmra.mxu1 %vm341_vm1, %v310_v11 }
  0x2b   : > { %538 = vperm.xlu2 %804, %v534_v47  }
  0x2e   : > { %543 = vperm.xlu0 %802, %v535_v12  }
  0x32   : > { %710 = vmatmul.msk.f32.gmra.mxu0 %vm341_vm1, %v311_v13  ;;  %715 = vmatmul.msk.f32.gmra.mxu1 %vm341_vm1, %v311_v13 }
  0x3a   : > { %711 = vmatmul.msk.f32.gmra.mxu0 %vm341_vm1, %v312_v14  ;;  %716 = vmatmul.msk.f32.gmra.mxu1 %vm341_vm1, %v312_v14  ;;  %v532_v14 = vld [vmem:[%s1110_s5] sm:$0xff] }
  0x73   : > { %v451_v54 = vpop.permute.xlu2 %450 }
  0x7d   : > { %v446_v57 = vpop.permute.xlu2 %445 }
  0x88   : > { %v335_v19 = vpop.permute.xlu0 %334  ;;  %v325_v20 = vpop.permute.xlu1 %324 }
  0x90   : > { %v330_v23 = vpop.permute.xlu0 %329  ;;  %v320_v30 = vpop.permute.xlu1 %319 }
  0x98   : > { %v441_v63 = vpop.permute.xlu0 %440  ;;  %v436_v4 = vpop.permute.xlu1 %435 }
  0x9f   : > { %v376_v15 = vpop.f32.mrf.mxu0  ;;  %v405_v16 = vpop.f32.mrf.mxu1 }
  0xa0   : > { %v377_v36 = vadd.f32 %v376_v15, %v320_v30  ;;  %v406_v37 = vadd.f32 %v405_v16, %v320_v30  ;;  %v533_v15 = vld [vmem:[%s1110_s5 + $0x8] sm:$0xff]  ;;  %v539_v16 = vpop.permute.xlu2 %538 }
  0xa2   : > { %v417_v42 = vmax.f32 %v377_v36, 0.0  ;;  %v418_v43 = vmax.f32 %v406_v37, 0.0 }
  0xa7   : > { %v379_v17 = vpop.f32.mrf.mxu0  ;;  %v408_v18 = vpop.f32.mrf.mxu1 }
  0xa8   : > { %v380_v31 = vadd.f32 %v379_v17, %v325_v20  ;;  %v409_v32 = vadd.f32 %v408_v18, %v325_v20 }
  0xaa   : > { %v419_v40 = vmax.f32 %v380_v31, 0.0  ;;  %v420_v41 = vmax.f32 %v409_v32, 0.0 }
  0xaf   : > { %v382_v21 = vpop.f32.mrf.mxu0  ;;  %v411_v22 = vpop.f32.mrf.mxu1 }
  0xb0   : > { %v383_v26 = vadd.f32 %v382_v21, %v330_v23  ;;  %v412_v27 = vadd.f32 %v411_v22, %v330_v23  ;;  %v544_v21 = vpop.permute.xlu0 %543 }
  0xb2   : > { %v421_v38 = vmax.f32 %v383_v26, 0.0  ;;  %v422_v39 = vmax.f32 %v412_v27, 0.0 }
  0xb7   : > { %v385_v24 = vpop.f32.mrf.mxu0  ;;  %v414_v25 = vpop.f32.mrf.mxu1 }
  0xb8   : > { %v386_v28 = vadd.f32 %v385_v24, %v335_v19  ;;  %v415_v29 = vadd.f32 %v414_v25, %v335_v19 }
  0xba   : > { %v423_v33 = vmax.f32 %v386_v28, 0.0  ;;  %v424_v34 = vmax.f32 %v415_v29, 0.0 }
  0xbc   : > { %478 = vmatpush.msra.mxu2 %v423_v33  ;;  %507 = vmatpush.msra.mxu3 %v424_v34 }
  0xbe   : > { %479 = vmatpush.msra.mxu2 %v421_v38  ;;  %508 = vmatpush.msra.mxu3 %v422_v39 }
  0xc0   : > { %480 = vmatpush.msra.mxu2 %v419_v40  ;;  %509 = vmatpush.msra.mxu3 %v420_v41 }
  0xc2   : > { %481 = vmatpush.msra.mxu2 %v417_v42  ;;  %510 = vmatpush.msra.mxu3 %v418_v43 }
  0xc3   : > { %717 = vmatmul.msk.f32.vlgmr.msra.gmra.mxu2 %vm453_vm2, %v425_v44  ;;  %721 = vmatmul.msk.f32.vlgmr.msra.gmra.mxu3 %vm453_vm2, %v425_v44 }
  0xcb   : > { %718 = vmatmul.msk.f32.gmra.mxu2 %vm453_vm2, %v426_v46  ;;  %722 = vmatmul.msk.f32.gmra.mxu3 %vm453_vm2, %v426_v46 }
  0xd3   : > { %719 = vmatmul.msk.f32.gmra.mxu2 %vm453_vm2, %v427_v48  ;;  %723 = vmatmul.msk.f32.gmra.mxu3 %vm453_vm2, %v427_v48 }
  0xdb   : > { %720 = vmatmul.msk.f32.gmra.mxu2 %vm453_vm2, %v428_v49  ;;  %724 = vmatmul.msk.f32.gmra.mxu3 %vm453_vm2, %v428_v49 }
 0x146   : > { %v483_v50 = vpop.f32.mrf.mxu2  ;;  %v512_v51 = vpop.f32.mrf.mxu3 }
 0x147   : > { %v484_v6 = vadd.f32 %v483_v50, %v436_v4  ;;  %v513_v8 = vadd.f32 %v512_v51, %v436_v4 }
 0x149   : > { %v524_v12 = vmax.f32 %v484_v6, 0.0  ;;  %v525_v13 = vmax.f32 %v513_v8, 0.0 }
 0x14e   : > { %v486_v52 = vpop.f32.mrf.mxu2  ;;  %v515_v53 = vpop.f32.mrf.mxu3 }
 0x14f   : > { %v487_v1 = vadd.f32 %v486_v52, %v441_v63  ;;  %v516_v5 = vadd.f32 %v515_v53, %v441_v63 }
 0x151   : > { %v526_v10 = vmax.f32 %v487_v1, 0.0  ;;  %v527_v11 = vmax.f32 %v516_v5, 0.0 }
 0x156   : > { %v489_v55 = vpop.f32.mrf.mxu2  ;;  %v518_v56 = vpop.f32.mrf.mxu3 }
 0x157   : > { %v490_v60 = vadd.f32 %v489_v55, %v446_v57  ;;  %v519_v0 = vadd.f32 %v518_v56, %v446_v57 }
 0x159   : > { %v528_v7 = vmax.f32 %v490_v60, 0.0  ;;  %v529_v9 = vmax.f32 %v519_v0, 0.0 }
 0x15e   : > { %v492_v58 = vpop.f32.mrf.mxu2  ;;  %v521_v59 = vpop.f32.mrf.mxu3 }
 0x15f   : > { %v493_v61 = vadd.f32 %v492_v58, %v451_v54  ;;  %v522_v62 = vadd.f32 %v521_v59, %v451_v54 }
 0x161   : > { %v530_v2 = vmax.f32 %v493_v61, 0.0  ;;  %v531_v3 = vmax.f32 %v522_v62, 0.0 }
 0x163   : > { %564 = vmatpush.msrb.mxu0 %v530_v2  ;;  %736 = vmatpush.msrb.mxu2 %v530_v2 }
 0x164   : > { %587 = vmatpush.msrb.mxu1 %v531_v3  ;;  %740 = vmatpush.msrb.mxu3 %v531_v3 }
 0x165   : > { %565 = vmatpush.msrb.mxu0 %v528_v7  ;;  %737 = vmatpush.msrb.mxu2 %v528_v7 }
 0x166   : > { %588 = vmatpush.msrb.mxu1 %v529_v9  ;;  %741 = vmatpush.msrb.mxu3 %v529_v9 }
 0x167   : > { %566 = vmatpush.msrb.mxu0 %v526_v10  ;;  %738 = vmatpush.msrb.mxu2 %v526_v10 }
 0x168   : > { %589 = vmatpush.msrb.mxu1 %v527_v11  ;;  %742 = vmatpush.msrb.mxu3 %v527_v11 }
 0x169   : > { %567 = vmatpush.msrb.mxu0 %v524_v12  ;;  %739 = vmatpush.msrb.mxu2 %v524_v12 }
 0x16a   : > { %590 = vmatpush.msrb.mxu1 %v525_v13  ;;  %743 = vmatpush.msrb.mxu3 %v525_v13 }
 0x16b   : > { %725 = vmatmul.msk.f32.vlgmr.msrb.gmra.mxu0 %vm453_vm2, %v532_v14  ;;  %726 = vmatmul.msk.f32.vlgmr.msrb.gmra.mxu2 %vm453_vm2, %v533_v15 }
 0x16c   : > { %727 = vmatmul.msk.f32.vlgmr.msrb.gmra.mxu1 %vm453_vm2, %v532_v14  ;;  %728 = vmatmul.msk.f32.vlgmr.msrb.gmra.mxu3 %vm453_vm2, %v533_v15 }
 0x1e8   : > { %v569_v17 = vpop.f32.mrf.mxu0 }
 0x1e9   : > { %v570_v18 = vadd.f32 %v569_v17, %v539_v16  ;;  %v592_v19 = vpop.f32.mrf.mxu1 }
 0x1ea   : > { %v593_v20 = vadd.f32 %v592_v19, %v539_v16 }
 0x1eb   : > { %598 = vst [vmem:[%s296_s12] sm:$0xff] %v570_v18 }
 0x1ec   : > { %599 = vst [vmem:[%s296_s12 + $0x8] sm:$0xff] %v593_v20 }
 0x1ee   : > { %v572_v22 = vpop.f32.mrf.mxu2 }
 0x1ef   : > { %v573_v23 = vadd.f32 %v572_v22, %v544_v21  ;;  %v595_v24 = vpop.f32.mrf.mxu3 }
 0x1f0   : > { %v596_v25 = vadd.f32 %v595_v24, %v544_v21 }
 0x1f1   : > { %600 = vst [vmem:[%s296_s12 + $0x10] sm:$0xff] %v573_v23 }
 0x1f2   : > { %601 = vst [vmem:[%s296_s12 + $0x18] sm:$0xff] %v596_v25 }
 0x1f3   : > { %832 = shalt.err (!%p829_p5)
}
 0x1f4   : > { %s886_s21 = smov 256   ;;  %s887_s8 = smov 16  }
 0x1f5   : > { %744 = dma.vmem_to_hbm [thread:$0]  (%p968_p4), %s618_s15, 512, %s620_s16, %s603_s27, %s886_s21, %s886_s21, %s887_s8  }
 0x1f6 PF: > { %p750_p6 = scmp.ge.s32.totalorder %s883_s29, 2  ;;  %s634_s10 = sand.u32 1, %s863_s24  }
 0x1f7   : > { %s635_s12 = scalar_lea.sflag [#allocation3], %s634_s10 }
 0x1f8   : > { %p747_p7 = pnand %p750_p6, %p975_p8 }
 0x1fa   : > { %p748_p9 = pneg %p747_p7 }
 0x1fc   : > { %858 = dma.done.wait (%p748_p9), %s635_s12, 512  }
 0x1fd   : > { %860 = vsyncadd (%p748_p9), %s635_s12, 4294966784  ;;  %s20_s29 = sadd.s32 1, %s883_s29   ;;  %s1115_s24 = smov %s867_s25 }
 0x1fe   : > { %p17_p10 = scmp.ge.s32.totalorder %s20_s29, 4   ;;  %s1116_s25 = smov %s871_s26 }
 0x1ff   : > { %s1117_s26 = smov %s981_s14  ;;  %s1118_s27 = smov %s879_s28 }
 0x200   : > { %s1119_s28 = smov %s1121_s9  ;;  %19 = sbr.rel (!%p17_p10) target bundleno = 4 (0x4), region = 83 }
 0x205   :  { %641 = vsyncpa [#allocation3], 1 }
 0x206   :  { %643 = vsyncpa [#allocation3 + $0x1], 1 }

</bundles_post_ra>
